<compile_context>
chip_gen: v7x
topology: tpu7x:2x2x1
jax: 0.10.0
libtpu: 0.0.40
codegen_flags: <defaults>
</compile_context>

<pallas_src>
import functools

import jax
import jax.numpy as jnp
from jax import lax
from jax.experimental import pallas as pl
from jax.experimental.pallas import tpu as pltpu


def _pair(v):
    if isinstance(v, (tuple, list)):
        a, b = v
        return int(a), int(b)
    return int(v), int(v)


def _round_up(x, m):
    return (x + m - 1) // m * m


def _cdiv(a, b):
    return -(-a // b)


_ACC_VREG_BUDGET = 16  # vregs reserved for one output-row-chunk accumulator


def _maxpool_kernel(x_ref, o_ref, *, ksize, stride, pad, dil, in_hw, out_hw,
                    neg_val):
    """Pool one (H, W, bc_tile) block into (h_out, w_out, bc_tile)."""
    kh_sz, kw_sz = ksize
    sh, sw = stride
    ph, pw = pad
    dh, dw = dil
    H, W = in_hw
    h_out, w_out = out_hw

    bct = o_ref.shape[-1]
    dtype = o_ref.dtype
    itemsize = jnp.dtype(dtype).itemsize
    sub = {4: 8, 2: 16, 1: 32}.get(itemsize, 8)      # sublanes per vreg

    # Static per-tap valid output ranges (PyTorch -inf padding folded in).
    taps = []
    for kh in range(kh_sz):
        a = kh * dh - ph
        oh_lo = max(0, (sh - 1 - a) // sh)
        oh_hi = min(h_out, (H - a + sh - 1) // sh)
        if oh_hi <= oh_lo:
            continue
        for kw in range(kw_sz):
            b = kw * dw - pw
            ow_lo = max(0, (sw - 1 - b) // sw)
            ow_hi = min(w_out, (W - b + sw - 1) // sw)
            if ow_hi <= ow_lo:
                continue
            taps.append((a, b, oh_lo, oh_hi, ow_lo, ow_hi))

    # Output-row chunking: keep each chunk accumulator within a small vreg
    # budget so the k*k max chain never spills, and store each output vreg
    # exactly once (no per-tap o_ref RMW -> vector-store slot stays unbound).
    vregs_per_row = max(1, _cdiv(w_out, sub)) * max(1, bct // 128)
    rows_chunk = min(h_out, max(1, _ACC_VREG_BUDGET // vregs_per_row))

    for c0 in range(0, h_out, rows_chunk):
        c1 = min(h_out, c0 + rows_chunk)
        rc = c1 - c0
        acc = None
        for (a, b, oh_lo, oh_hi, ow_lo, ow_hi) in taps:
            lo_h = max(oh_lo, c0)
            hi_h = min(oh_hi, c1)
            if hi_h <= lo_h:
                continue                    # tap is pure padding in this chunk
            nh = hi_h - lo_h
            nw = ow_hi - ow_lo
            ih0 = lo_h * sh + a
            iw0 = ow_lo * sw + b

            # Strided per-tap read straight from the VMEM ref (no whole-block
            # value, no strided slicing of a live value).
            if sh > 1 and nh > 1:
                h_idx = pl.ds(ih0, nh, stride=sh)
            else:
                h_idx = pl.ds(ih0, nh)
            if sw > 1 and nw > 1:
                w_idx = pl.ds(iw0, nw, stride=sw)
            else:
                w_idx = pl.ds(iw0, nw)
            tap = x_ref[h_idx, w_idx, :]

            # Boundary taps (padding case): pad with the identity of max so
            # the accumulator stays a pure value chain (single final store).
            if ow_lo > 0 or ow_hi < w_out:
                pieces = []
                if ow_lo > 0:
                    pieces.append(jnp.full((nh, ow_lo, bct), neg_val, dtype))
                pieces.append(tap)
                if ow_hi < w_out:
                    pieces.append(
                        jnp.full((nh, w_out - ow_hi, bct), neg_val, dtype))
                tap = jnp.concatenate(pieces, axis=1)
            if lo_h > c0 or hi_h < c1:
                pieces = []
                if lo_h > c0:
                    pieces.append(
                        jnp.full((lo_h - c0, w_out, bct), neg_val, dtype))
                pieces.append(tap)
                if hi_h < c1:
                    pieces.append(
                        jnp.full((c1 - hi_h, w_out, bct), neg_val, dtype))
                tap = jnp.concatenate(pieces, axis=0)

            acc = tap if acc is None else jnp.maximum(acc, tap)

        if acc is None:                      # cannot happen for valid params
            acc = jnp.full((rc, w_out, bct), neg_val, dtype)
        o_ref[c0:c1, :, :] = acc             # each output vreg written once


def _tpu_vmem_and_n_tc():
    """Returns (VMEM bytes per core, #TensorCores behind one JAX device)."""
    vmem_cap = 64 * 1024 * 1024              # conservative fallback (v7x floor)
    try:
        vmem_cap = int(pltpu.get_tpu_info().vmem_capacity_bytes)
    except Exception:
        pass
    n_tc = 1
    try:
        kind = jax.devices()[0].device_kind.lower()
        # Chips exposing 2 TensorCores behind one device (megacore / v7x).
        if any(t in kind for t in ("v4", "v5p", "v7", "7x")):
            n_tc = 2
    except Exception:
        pass
    return vmem_cap, n_tc


def _choose_bc_tile(H, W, h_out, w_out, bc, itemsize):
    """Pick the N*C lane-tile from the hardware VMEM budget."""
    sub = {4: 8, 2: 16, 1: 32}.get(itemsize, 8)
    per_lane = (H * _round_up(W, sub)
                + h_out * _round_up(w_out, sub)) * itemsize
    vmem_cap, n_tc = _tpu_vmem_and_n_tc()
    # 2x(in+out) double-buffered blocks within ~65% of VMEM (headroom for
    # semaphores / compiler scratch); absolute cap keeps step granularity
    # reasonable on 128 MiB parts.
    budget = min(int(vmem_cap * 0.65), 64 * 1024 * 1024)
    bc_tile = (budget // (2 * per_lane)) // 128 * 128
    bc_tile = max(128, bc_tile)
    bc_ceil = _round_up(bc, 128)
    bc_tile = min(bc_tile, bc_ceil)

    # Only force a multi-step split on chips with 2 TensorCores behind one
    # device (on v5e/v6e a forced split is pure serial overhead); prefer an
    # even number of grid steps so both cores get equal work.
    if n_tc >= 2 and bc_ceil > 128:
        steps = _cdiv(bc_ceil, bc_tile)
        if steps == 1:
            bc_tile = _round_up(_cdiv(bc_ceil, 2), 128)
        elif steps % 2 == 1:
            cand = _round_up(_cdiv(bc_ceil, steps - 1), 128)
            if 2 * per_lane * cand <= budget:
                bc_tile = cand

    usage = 2 * per_lane * bc_tile
    vmem_limit = min(vmem_cap - (2 << 20),
                     max(16 << 20, int(usage * 1.25) + (4 << 20)))
    return bc_tile, int(vmem_limit)


def maxpool2d_hwc_pallas(x_hwc, *, ksize, stride, pad, dil, out_hw, neg_val):
    """Max-pool on a channels-last (H, W, BC) array (BC rides the lanes)."""
    H, W, bc = x_hwc.shape
    h_out, w_out = out_hw
    itemsize = jnp.dtype(x_hwc.dtype).itemsize
    bc_tile, vmem_limit = _choose_bc_tile(H, W, h_out, w_out, bc, itemsize)
    # cdiv grid: the ragged final lane-block is masked by Pallas (garbage
    # lanes are safe -- the reduction is purely per-lane elementwise).
    grid = (_cdiv(bc, bc_tile),)
    # TODO(synk): add a second grid axis over output-row blocks (with a
    # kh > sh input halo) for very large H*W where even bc_tile=128 would
    # overflow the per-core VMEM budget.

    kernel = functools.partial(
        _maxpool_kernel, ksize=ksize, stride=stride, pad=pad, dil=dil,
        in_hw=(H, W), out_hw=(h_out, w_out), neg_val=neg_val)

    return pl.pallas_call(
        kernel,
        out_shape=jax.ShapeDtypeStruct((h_out, w_out, bc), x_hwc.dtype),
        grid_spec=pltpu.PrefetchScalarGridSpec(
            num_scalar_prefetch=0,
            grid=grid,
            in_specs=[pl.BlockSpec((H, W, bc_tile), lambda i: (0, 0, i))],
            out_specs=pl.BlockSpec((h_out, w_out, bc_tile),
                                   lambda i: (0, 0, i)),
        ),
        compiler_params=pltpu.CompilerParams(
            dimension_semantics=("parallel",),
            vmem_limit_bytes=vmem_limit,
        ),
    )(x_hwc)


def maxpool2d_pallas(x, kernel_size, stride=None, padding=0, dilation=1,
                     return_indices=False, ceil_mode=False):
    """Functional equivalent of nn.MaxPool2d(...) on NCHW inputs."""
    if return_indices:
        # TODO(synk): return_indices (flat argmax indices) not implemented.
        raise NotImplementedError("return_indices is not supported")
    if ceil_mode:
        # TODO(synk): ceil_mode output-size rounding not implemented.
        raise NotImplementedError("ceil_mode is not supported")

    kh, kw = _pair(kernel_size)
    sh, sw = _pair(stride) if stride is not None else (kh, kw)
    ph, pw = _pair(padding)
    dh, dw = _pair(dilation)
    if 2 * ph > kh or 2 * pw > kw:
        raise ValueError("padding should be at most half of kernel size")

    N, C, H, W = x.shape
    h_out = (H + 2 * ph - dh * (kh - 1) - 1) // sh + 1
    w_out = (W + 2 * pw - dw * (kw - 1) - 1) // sw + 1

    if jnp.issubdtype(x.dtype, jnp.floating):
        neg_val = float("-inf")
    else:
        neg_val = int(jnp.iinfo(x.dtype).min)

    # NCHW -> (H, W, N*C).  Each transpose is a full HBM pass; graphs that
    # already carry channels-last activations should call
    # maxpool2d_hwc_pallas directly and skip both (pooling is HBM-bound).
    bc = N * C
    x_hwc = jnp.transpose(x, (2, 3, 0, 1)).reshape(H, W, bc)
    out_hwc = maxpool2d_hwc_pallas(
        x_hwc, ksize=(kh, kw), stride=(sh, sw), pad=(ph, pw), dil=(dh, dw),
        out_hw=(h_out, w_out), neg_val=neg_val)
    out = out_hwc.reshape(h_out, w_out, N, C)
    return jnp.transpose(out, (2, 3, 0, 1))


class MaxPool2dPallas:
    """JAX/Pallas mirror of octconv._MaxPool2d (handles (hf, lf) tuple inputs)."""

    def __init__(self, kernel_size, stride=None, padding=0, dilation=1,
                 return_indices=False, ceil_mode=False):
        self._pool = functools.partial(
            maxpool2d_pallas,
            kernel_size=kernel_size, stride=stride, padding=padding,
            dilation=dilation, return_indices=return_indices,
            ceil_mode=ceil_mode)

    def __call__(self, x):
        if isinstance(x, tuple):
            hf, lf = x
            hf = self._pool(hf) if isinstance(hf, jnp.ndarray) else hf
            lf = self._pool(lf) if isinstance(lf, jnp.ndarray) else lf
            return (hf, lf)
        return self._pool(x)


def _reference_maxpool(x, k, s, p, d=1):
    if p > 0:
        x = jnp.pad(x, ((0, 0), (0, 0), (p, p), (p, p)),
                    constant_values=-jnp.inf)
    return lax.reduce_window(
        x, -jnp.inf, lax.max,
        window_dimensions=(1, 1, k, k),
        window_strides=(1, 1, s, s),
        padding="VALID",
        window_dilation=(1, 1, d, d))


if __name__ == "__main__":
    key = jax.random.PRNGKey(0)
    k1, k2, k3 = jax.random.split(key, 3)
    x = jax.random.normal(k1, (2, 4, 16, 16), jnp.float32)
    hf = jax.random.normal(k2, (2, 4, 16, 16), jnp.float32)
    lf = jax.random.normal(k3, (2, 4, 8, 8), jnp.float32)

    # Plain tensor input, kernel_size=2 (stride defaults to kernel_size).
    pool2 = MaxPool2dPallas(kernel_size=2)
    y = pool2(x)
    jax.block_until_ready(y)
    y_ref = _reference_maxpool(x, 2, 2, 0)
    assert y.shape == (2, 4, 8, 8)
    assert jnp.allclose(y, y_ref), "maxpool k=2 mismatch"

    # Tuple (hf, lf) input — the octconv path of the module's forward().
    yh, yl = pool2((hf, lf))
    jax.block_until_ready((yh, yl))
    assert jnp.allclose(yh, _reference_maxpool(hf, 2, 2, 0))
    assert jnp.allclose(yl, _reference_maxpool(lf, 2, 2, 0))

    # Padding path (folded into the kernel): kernel_size=3, stride=2, padding=1.
    pool3 = MaxPool2dPallas(kernel_size=3, stride=2, padding=1)
    y3 = pool3(x)
    jax.block_until_ready(y3)
    assert jnp.allclose(y3, _reference_maxpool(x, 3, 2, 1)), "maxpool k=3 mismatch"

    # Overlapping-window path without padding: kernel_size=3, stride=1.
    pool31 = MaxPool2dPallas(kernel_size=3, stride=1)
    y31 = pool31(x)
    jax.block_until_ready(y31)
    assert jnp.allclose(y31, _reference_maxpool(x, 3, 1, 0)), "maxpool k=3 s=1 mismatch"

    print("KERNEL_OK")
</pallas_src>

<mosaic_0001>
module attributes {stable_mosaic.version = 11 : i64} {
  func.func @_maxpool_kernel(%arg0: i32, %arg1: memref<16x16x128xf32, #tpu.memory_space<vmem>>, %arg2: memref<8x8x128xf32, #tpu.memory_space<vmem>>) attributes {dimension_semantics = [#tpu.dimension_semantics<parallel>], iteration_bounds = array<i64: 1>, scalar_prefetch = 0 : i64, scratch_operands = 0 : i64, tpu.core_type = #tpu.core_type<tc>, window_params = [{transform_indices = @transform_0, window_bounds = array<i64: 16, 16, 128>}, {transform_indices = @transform_1, window_bounds = array<i64: 8, 8, 128>}]} {
    %c0 = arith.constant 0 : index
    %c0_0 = arith.constant 0 : index
    %c0_1 = arith.constant 0 : index
    %0 = tpu.strided_load %arg1[%c0, %c0_0, %c0_1] {strides = array<i32: 2, 2, 1>} : memref<16x16x128xf32, #tpu.memory_space<vmem>>, vector<8x8x128xf32>
    %c0_2 = arith.constant 0 : index
    %c1 = arith.constant 1 : index
    %c0_3 = arith.constant 0 : index
    %1 = tpu.strided_load %arg1[%c0_2, %c1, %c0_3] {strides = array<i32: 2, 2, 1>} : memref<16x16x128xf32, #tpu.memory_space<vmem>>, vector<8x8x128xf32>
    %2 = arith.maximumf %0, %1 : vector<8x8x128xf32>
    %c1_4 = arith.constant 1 : index
    %c0_5 = arith.constant 0 : index
    %c0_6 = arith.constant 0 : index
    %3 = tpu.strided_load %arg1[%c1_4, %c0_5, %c0_6] {strides = array<i32: 2, 2, 1>} : memref<16x16x128xf32, #tpu.memory_space<vmem>>, vector<8x8x128xf32>
    %4 = arith.maximumf %2, %3 : vector<8x8x128xf32>
    %c1_7 = arith.constant 1 : index
    %c1_8 = arith.constant 1 : index
    %c0_9 = arith.constant 0 : index
    %5 = tpu.strided_load %arg1[%c1_7, %c1_8, %c0_9] {strides = array<i32: 2, 2, 1>} : memref<16x16x128xf32, #tpu.memory_space<vmem>>, vector<8x8x128xf32>
    %6 = arith.maximumf %4, %5 : vector<8x8x128xf32>
    %c0_10 = arith.constant 0 : index
    %c0_11 = arith.constant 0 : index
    %c0_12 = arith.constant 0 : index
    %7 = vector.load %arg2[%c0_10, %c0_11, %c0_12] : memref<8x8x128xf32, #tpu.memory_space<vmem>>, vector<8x8x128xf32>
    tpu.vector_store %arg2[%c0_10, %c0_11, %c0_12], %6 {strides = array<i32>} : memref<8x8x128xf32, #tpu.memory_space<vmem>>, vector<8x8x128xf32>,
    return
  }
  func.func @transform_0(%arg0: i32) -> (i32, i32, i32) {
    %c0_i32 = arith.constant 0 : i32
    %c0_i32_0 = arith.constant 0 : i32
    %c0_i32_1 = arith.constant 0 : i32
    return %c0_i32, %c0_i32_0, %arg0 : i32, i32, i32
  }
  func.func @transform_1(%arg0: i32) -> (i32, i32, i32) {
    %c0_i32 = arith.constant 0 : i32
    %c0_i32_0 = arith.constant 0 : i32
    %c0_i32_1 = arith.constant 0 : i32
    return %c0_i32, %c0_i32_0, %arg0 : i32, i32, i32
  }
}

</mosaic_0001>

<bundles_post_ra>
// kernel: tpu_custom_call.1
= control target key start
LH: loop header
LB: loop body
LE: loop exit
PB: predicated region body
PF: predicated region fallthrough
CT: control target
= control target key end

     0   :  { %s314_s0 = inlined_call_operand.vmem [shape: f32[16,16,8], index: 0, kind: input, shape index: {}]   ;;  %s315_s1 = inlined_call_operand.hbm [shape: f32[8,8,8], index: 1, kind: output, shape index: {}]  }
   0x1   :  { %v9_v0 = vld [vmem:[%s314_s0] ss:$2 sm:$0xff]  ;;  %v142_v1 = vld [vmem:[%s314_s0 + $0x1] ss:$2 sm:$0xff]  ;;  %v150_v2 = vld [vmem:[%s314_s0 + $0x10] ss:$2 sm:$0xff] }
   0x2   :  { %v40_v3 = vmax.f32 %v9_v0, %v142_v1  ;;  %v135_v4 = vld [vmem:[%s314_s0 + $0x20] ss:$2 sm:$0xff]  ;;  %v143_v5 = vld [vmem:[%s314_s0 + $0x21] ss:$2 sm:$0xff]  ;;  %v158_v6 = vld [vmem:[%s314_s0 + $0x11] ss:$2 sm:$0xff] }
   0x3   :  { %v41_v7 = vmax.f32 %v135_v4, %v143_v5  ;;  %v151_v8 = vld [vmem:[%s314_s0 + $0x30] ss:$2 sm:$0xff]  ;;  %v136_v9 = vld [vmem:[%s314_s0 + $0x40] ss:$2 sm:$0xff]  ;;  %v159_v11 = vld [vmem:[%s314_s0 + $0x31] ss:$2 sm:$0xff] }
   0x4   :  { %v64_v10 = vmax.f32 %v40_v3, %v150_v2  ;;  %v144_v12 = vld [vmem:[%s314_s0 + $0x41] ss:$2 sm:$0xff]  ;;  %v152_v13 = vld [vmem:[%s314_s0 + $0x50] ss:$2 sm:$0xff]  ;;  %v137_v16 = vld [vmem:[%s314_s0 + $0x60] ss:$2 sm:$0xff] }
   0x5   :  { %v65_v14 = vmax.f32 %v41_v7, %v151_v8  ;;  %v42_v15 = vmax.f32 %v136_v9, %v144_v12  ;;  %v145_v17 = vld [vmem:[%s314_s0 + $0x61] ss:$2 sm:$0xff]  ;;  %v153_v18 = vld [vmem:[%s314_s0 + $0x70] ss:$2 sm:$0xff]  ;;  %v160_v20 = vld [vmem:[%s314_s0 + $0x51] ss:$2 sm:$0xff] }
   0x6   :  { %v88_v19 = vmax.f32 %v64_v10, %v158_v6  ;;  %v43_v21 = vmax.f32 %v137_v16, %v145_v17  ;;  %v138_v22 = vld [vmem:[%s314_s0 + $0x80] ss:$2 sm:$0xff]  ;;  %v146_v23 = vld [vmem:[%s314_s0 + $0x81] ss:$2 sm:$0xff]  ;;  %v161_v26 = vld [vmem:[%s314_s0 + $0x71] ss:$2 sm:$0xff] }
   0x7   :  { %v89_v24 = vmax.f32 %v65_v14, %v159_v11  ;;  %v66_v25 = vmax.f32 %v42_v15, %v152_v13  ;;  %v44_v27 = vmax.f32 %v138_v22, %v146_v23  ;;  %v154_v28 = vld [vmem:[%s314_s0 + $0x90] ss:$2 sm:$0xff]  ;;  %v139_v29 = vld [vmem:[%s314_s0 + $0xa0] ss:$2 sm:$0xff]  ;;  %v162_v31 = vld [vmem:[%s314_s0 + $0x91] ss:$2 sm:$0xff] }
   0x8   :  { %96 = vst [vmem:[#allocation2] sm:$0xff] %v88_v19  ;;  %v67_v30 = vmax.f32 %v43_v21, %v153_v18  ;;  %v147_v32 = vld [vmem:[%s314_s0 + $0xa1] ss:$2 sm:$0xff]  ;;  %v155_v33 = vld [vmem:[%s314_s0 + $0xb0] ss:$2 sm:$0xff] }
   0x9   :  { %97 = vst [vmem:[#allocation2 + $0x8] sm:$0xff] %v89_v24  ;;  %v90_v34 = vmax.f32 %v66_v25, %v160_v20  ;;  %v68_v35 = vmax.f32 %v44_v27, %v154_v28  ;;  %v45_v36 = vmax.f32 %v139_v29, %v147_v32  ;;  %v140_v37 = vld [vmem:[%s314_s0 + $0xc0] ss:$2 sm:$0xff]  ;;  %v148_v38 = vld [vmem:[%s314_s0 + $0xc1] ss:$2 sm:$0xff] }
   0xa   :  { %v156_v39 = vld [vmem:[%s314_s0 + $0xd0] ss:$2 sm:$0xff]  ;;  %v91_v40 = vmax.f32 %v67_v30, %v161_v26  ;;  %v163_v41 = vld [vmem:[%s314_s0 + $0xb1] ss:$2 sm:$0xff]  ;;  %v46_v42 = vmax.f32 %v140_v37, %v148_v38  ;;  %v141_v43 = vld [vmem:[%s314_s0 + $0xe0] ss:$2 sm:$0xff] }
   0xb   :  { %v149_v44 = vld [vmem:[%s314_s0 + $0xe1] ss:$2 sm:$0xff]  ;;  %98 = vst [vmem:[#allocation2 + $0x10] sm:$0xff] %v90_v34  ;;  %v92_v45 = vmax.f32 %v68_v35, %v162_v31  ;;  %v69_v46 = vmax.f32 %v45_v36, %v155_v33  ;;  %v164_v47 = vld [vmem:[%s314_s0 + $0xd1] ss:$2 sm:$0xff] }
   0xc   :  { %v47_v48 = vmax.f32 %v141_v43, %v149_v44  ;;  %v157_v49 = vld [vmem:[%s314_s0 + $0xf0] ss:$2 sm:$0xff] }
   0xd   :  { %6 = vsyncpa [#allocation3], 0  ;;  %99 = vst [vmem:[#allocation2 + $0x18] sm:$0xff] %v91_v40  ;;  %v70_v50 = vmax.f32 %v46_v42, %v156_v39  ;;  %v165_v51 = vld [vmem:[%s314_s0 + $0xf1] ss:$2 sm:$0xff]  ;;  %v93_v52 = vmax.f32 %v69_v46, %v163_v41  ;;  %s193_s12 = smov [#allocation2]  }
   0xe   :  { %100 = vst [vmem:[#allocation2 + $0x20] sm:$0xff] %v92_v45  ;;  %v71_v53 = vmax.f32 %v47_v48, %v157_v49  ;;  %s109_s13 = sshll.u32 %s193_s12, 4  ;;  %s110_s13 = int_to_ptr.vmem [resolvable:$true] %s109_s13 }
   0xf   :  { %v94_v54 = vmax.f32 %v70_v50, %v164_v47  ;;  %101 = vst [vmem:[#allocation2 + $0x28] sm:$0xff] %v93_v52  ;;  %s169_s14 = scalar_lea.vmem %s110_s13, 1024  ;;  %p174_p1 = scmp.lt.s32.totalorder %s110_s13, %s110_s13 }
  0x10   :  { %v95_v55 = vmax.f32 %v71_v53, %v165_v51  ;;  %p170_p0 = scmp.ne.s32.totalorder %s110_s13, %s169_s14  ;;  %p175_p2 = scmp.lt.s32.totalorder %s169_s14, %s169_s14 }
  0x11   :  { %102 = vst [vmem:[#allocation2 + $0x30] sm:$0xff] %v94_v54 }
  0x12   :  { %103 = vst [vmem:[#allocation2 + $0x38] sm:$0xff] %v95_v55  ;;  %p176_p3 = por %p175_p2, %p174_p1 }
  0x14   :  { %p177_p4 = pnand %p176_p3, %p170_p0 }
  0x16   :  { %180 = shalt.err (!%p177_p4)
}
  0x17   :  { %s181_s16 = scalar_lea.hbm %s315_s1, 1024 }
  0x18   :  { %p182_p5 = scmp.ne.s32.totalorder %s315_s1, %s181_s16  ;;  %p185_p6 = scmp.lt.u32.totalorder %s181_s16, %s315_s1 }
  0x1a   :  { %p187_p7 = pnand %p185_p6, %p182_p5 }
  0x1c   :  { %190 = shalt.err (!%p187_p7)
}
  0x1d   :  { %s194_s21 = smov 128   ;;  %s195_s22 = smov 8  }
  0x1e   :  { %115 = dma.vmem_to_hbm [thread:$0]  %s110_s13, 1024, %s315_s1, [#allocation3], %s194_s21, %s194_s21, %s195_s22  }
  0x1f   :  { %191 = dma.done.wait [#allocation3], 1024  }
  0x20   :  { %192 = vsyncadd [#allocation3], 4294966272 }
  0x21   :  { %119 = vsyncpa [#allocation3], 1 }

</bundles_post_ra>
